<compile_context>
chip_gen: v6e
topology: v6e:2x2x1
jax: 0.10.0
libtpu: 0.0.40
codegen_flags: <defaults>
</compile_context>

<pallas_src>
import math

import jax
import jax.numpy as jnp
from jax.experimental import pallas as pl
from jax.experimental.pallas import tpu as pltpu


def lorentz_decoder_kernel(x_ref, w_ref, b_ref, out_ref):
    """One row-tile of probs = x @ W_eff + b_eff.

    x_ref  : VMEM (TN, Din)      row tile of node embeddings (pipelined)
    w_ref  : VMEM (Din, Dout_p)  2 * cls.T with the time row negated, zero-padded, resident
    b_ref  : VMEM (1, Dout_p)    bias + 2*c, zero-padded, resident
    out_ref: VMEM (TN, Dout_p)
    """
    out_ref[...] = (
        jnp.dot(x_ref[...], w_ref[...], preferred_element_type=jnp.float32)
        + b_ref[...]
    )


def lorentz_decoder(x, cls, bias, c, *, tn=512):
    """probs = 2*c + 2*cinner(x, cls) + bias  (Lorentz Minkowski inner product).

    x    : (N, Din)    f32  Lorentz-model node embeddings
    cls  : (Dout, Din) f32  classifier ManifoldParameter
    bias : (Dout,)     f32
    c    : scalar curvature
    """
    n, d_in = x.shape
    d_out = cls.shape[0]

    # Lane-dense output: pad the class dimension up to a multiple of 128.
    d_out_p = ((d_out + 127) // 128) * 128

    # Row tile: multiple of 8 sublanes; clamp to (sublane-rounded) N for tiny inputs.
    tn = ((max(8, tn) + 7) // 8) * 8
    tn = min(tn, ((n + 7) // 8) * 8)

    x_f = x.astype(jnp.float32)

    # Fold the Lorentz sign flip (negate the time row of cls.T), the factor 2, and the 2*c
    # offset into the tiny parameters during the zero-padding copy they need anyway.
    # Exactly equivalent:  2c + 2 * (x' @ cls.T) + bias  ==  x @ (2*W_signed) + (bias + 2c).
    w_eff = (2.0 * cls.T.astype(jnp.float32)).at[0, :].multiply(-1.0)   # (Din, Dout)
    w_p = jnp.zeros((d_in, d_out_p), jnp.float32).at[:, :d_out].set(w_eff)
    b_eff = bias.astype(jnp.float32) + 2.0 * jnp.asarray(c, jnp.float32)
    b_p = jnp.zeros((1, d_out_p), jnp.float32).at[:, :d_out].set(b_eff[None, :])

    out_p = pl.pallas_call(
        lorentz_decoder_kernel,
        out_shape=jax.ShapeDtypeStruct((n, d_out_p), jnp.float32),
        grid_spec=pltpu.PrefetchScalarGridSpec(
            num_scalar_prefetch=0,
            grid=(pl.cdiv(n, tn),),                            # ragged grid, no x padding copy
            in_specs=[
                pl.BlockSpec((tn, d_in), lambda i: (i, 0)),    # x row tile (pipelined)
                pl.BlockSpec((d_in, d_out_p), lambda i: (0, 0)),   # resident effective weight
                pl.BlockSpec((1, d_out_p), lambda i: (0, 0)),      # resident effective bias
            ],
            out_specs=pl.BlockSpec((tn, d_out_p), lambda i: (i, 0)),
        ),
        compiler_params=pltpu.CompilerParams(
            dimension_semantics=("parallel",),
        ),
    )(x_f, w_p, b_p)

    # Strip class padding outside the kernel (rows were never padded).
    return out_p[:, :d_out]


def reference(x, cls, bias, c):
    x_l = x.at[:, 0].multiply(-1.0)                       # Lorentz cinner: negate time coord
    cinner = jnp.dot(x_l, cls.T, precision=jax.lax.Precision.HIGHEST)
    return 2.0 * c + 2.0 * cinner + bias[None, :]


if __name__ == "__main__":
    # Small node-classification shapes: N nodes, Lorentz dim = 1 time + 32 space, 7 classes.
    N, IN_FEATURES, OUT_CLASSES = 200, 33, 7
    C = 1.0

    key = jax.random.PRNGKey(0)
    kx, kw = jax.random.split(key)

    # Node embeddings on the Lorentz manifold: space ~ N(0, 1), time = sqrt(1/c + |space|^2).
    x_space = jax.random.normal(kx, (N, IN_FEATURES - 1), dtype=jnp.float32)
    x_time = jnp.sqrt(1.0 / C + jnp.sum(x_space * x_space, axis=-1, keepdims=True))
    x = jnp.concatenate([x_time, x_space], axis=-1)

    # cls ~ manifold.random_normal((OUT_CLASSES, IN_FEATURES), std=1/sqrt(input_dim)),
    # projected onto the hyperboloid the same way.
    std = 1.0 / math.sqrt(IN_FEATURES)
    w_space = std * jax.random.normal(kw, (OUT_CLASSES, IN_FEATURES - 1), dtype=jnp.float32)
    w_time = jnp.sqrt(1.0 / C + jnp.sum(w_space * w_space, axis=-1, keepdims=True))
    cls = jnp.concatenate([w_time, w_space], axis=-1)

    bias = jnp.zeros((OUT_CLASSES,), dtype=jnp.float32)   # use_bias=True, zero-initialized

    # tn=128 -> grid=(2,) with a ragged (masked) boundary block on this small example.
    probs = lorentz_decoder(x, cls, bias, C, tn=128)
    probs = jax.block_until_ready(probs)

    ref = reference(x, cls, bias, C)
    assert probs.shape == (N, OUT_CLASSES)
    assert jnp.allclose(probs, ref, atol=1e-4, rtol=1e-4), "mismatch vs reference"

    # TODO(synk): the module's forward also returns `adj` unchanged (tuple passthrough);
    #             that is not a tensor op and is handled outside the kernel.

    print("KERNEL_OK")
</pallas_src>

<mosaic_0001>
module attributes {stable_mosaic.version = 11 : i64} {
  func.func @lorentz_decoder_kernel(%arg0: i32, %arg1: memref<128x33xf32, #tpu.memory_space<vmem>>, %arg2: memref<33x128xf32, #tpu.memory_space<vmem>>, %arg3: memref<1x128xf32, #tpu.memory_space<vmem>>, %arg4: memref<128x128xf32, #tpu.memory_space<vmem>>) attributes {dimension_semantics = [#tpu.dimension_semantics<parallel>], iteration_bounds = array<i64: 2>, scalar_prefetch = 0 : i64, scratch_operands = 0 : i64, tpu.core_type = #tpu.core_type<tc>, window_params = [{transform_indices = @transform_0, window_bounds = array<i64: 128, 33>}, {pipeline_mode = #tpu.pipeline_mode<synchronous>, transform_indices = @transform_1, window_bounds = array<i64: 33, 128>}, {pipeline_mode = #tpu.pipeline_mode<synchronous>, transform_indices = @transform_2, window_bounds = array<i64: 1, 128>}, {transform_indices = @transform_3, window_bounds = array<i64: 128, 128>}]} {
    %c0 = arith.constant 0 : index
    %c0_0 = arith.constant 0 : index
    %0 = vector.load %arg1[%c0, %c0_0] : memref<128x33xf32, #tpu.memory_space<vmem>>, vector<128x33xf32>
    %c0_1 = arith.constant 0 : index
    %c0_2 = arith.constant 0 : index
    %1 = vector.load %arg2[%c0_1, %c0_2] : memref<33x128xf32, #tpu.memory_space<vmem>>, vector<33x128xf32>
    %cst = arith.constant dense<0.000000e+00> : vector<128x128xf32>
    %2 = tpu.matmul %0, %1, %cst {dimension_numbers = #tpu.dot_dimension_numbers<[1], [0], [0], [1], [0, 0, 1, 1], [], []>} : vector<128x33xf32>, vector<33x128xf32>, vector<128x128xf32> -> vector<128x128xf32>
    %c0_3 = arith.constant 0 : index
    %c0_4 = arith.constant 0 : index
    %3 = vector.load %arg3[%c0_3, %c0_4] : memref<1x128xf32, #tpu.memory_space<vmem>>, vector<1x128xf32>
    %4 = vector.broadcast %3 : vector<1x128xf32> to vector<128x128xf32>
    %5 = arith.addf %2, %4 : vector<128x128xf32>
    %c0_5 = arith.constant 0 : index
    %c0_6 = arith.constant 0 : index
    %6 = vector.load %arg4[%c0_5, %c0_6] : memref<128x128xf32, #tpu.memory_space<vmem>>, vector<128x128xf32>
    tpu.vector_store %arg4[%c0_5, %c0_6], %5 {strides = array<i32>} : memref<128x128xf32, #tpu.memory_space<vmem>>, vector<128x128xf32>,
    return
  }
  func.func @transform_0(%arg0: i32) -> (i32, i32) {
    %c0_i32 = arith.constant 0 : i32
    %c0_i32_0 = arith.constant 0 : i32
    return %arg0, %c0_i32 : i32, i32
  }
  func.func @transform_1(%arg0: i32) -> (i32, i32) {
    %c0_i32 = arith.constant 0 : i32
    %c0_i32_0 = arith.constant 0 : i32
    %c0_i32_1 = arith.constant 0 : i32
    return %c0_i32, %c0_i32_0 : i32, i32
  }
  func.func @transform_2(%arg0: i32) -> (i32, i32) {
    %c0_i32 = arith.constant 0 : i32
    %c0_i32_0 = arith.constant 0 : i32
    %c0_i32_1 = arith.constant 0 : i32
    return %c0_i32, %c0_i32_0 : i32, i32
  }
  func.func @transform_3(%arg0: i32) -> (i32, i32) {
    %c0_i32 = arith.constant 0 : i32
    %c0_i32_0 = arith.constant 0 : i32
    return %arg0, %c0_i32 : i32, i32
  }
}

</mosaic_0001>

<bundles_post_ra>
// kernel: tpu_custom_call.1
= control target key start
LH: loop header
LB: loop body
LE: loop exit
PB: predicated region body
PF: predicated region fallthrough
CT: control target
= control target key end

     0   :  { %8 = vsyncpa [#allocation3], 0  ;;  %s936_s0 = inlined_call_operand.vmem [shape: f32[200,33], index: 0, kind: input, shape index: {}]   ;;  %s937_s1 = inlined_call_operand.vmem [shape: f32[33,128], index: 1, kind: input, shape index: {}]   ;;  %s938_s2 = inlined_call_operand.vmem [shape: f32[1,128], index: 2, kind: input, shape index: {}]   ;;  %s939_s3 = inlined_call_operand.hbm [shape: f32[200,128], index: 3, kind: output, shape index: {}]  }
   0x1   :  { %10 = vsyncpa [#allocation3 + $0x1], 0  ;;  %s745_s12 = smov 0   ;;  %s747_s13 = smov 0  }
   0x2   :  { %s749_s14 = smov 0   ;;  %s751_s15 = smov 0  }
   0x3 LB: > { %s766_s16 = sadd.s32 4294967295, %s720_s15   ;;  %s520_s17 = sadd.s32 4294967294, %s720_s15   ;;  %s720_s15 = sphi %s751_s15, %s945_s15   ;;  %s716_s14 = sphi %s749_s14, %s944_s14   ;;  %s712_s13 = sphi %s747_s13, %s943_s13   ;;  %s708_s12 = sphi %s745_s12, %s942_s12  }
   0x4   : > { %s770_s18 = sadd.s32 1, %s720_s15   ;;  %s91_s19 = sadd.s32 1, %s716_s14 }
   0x5   : > { %s88_s20 = ssub.s32 %s720_s15, %s770_s18  ;;  %p101_p0 = scmp.ne.s32.totalorder %s716_s14, %s712_s13 }
   0x6   : > { %p89_p1 = scmp.eq.s32.totalorder %s88_s20, 0  ;;  %p102_p2 = scmp.eq.s32.totalorder %s766_s16, 1 }
   0x7   : > { %p107_p3 = scmp.ne.s32.totalorder %s712_s13, %s708_s12  ;;  %p108_p4 = scmp.eq.s32.totalorder %s520_s17, 1 }
   0x8   : > { %s781_s21 = scalar_select %p89_p1, %s716_s14, %s91_s19  }
   0x9   : > { %p783_p5 = por %p102_p2, %p101_p0  ;;  %p787_p6 = por %p108_p4, %p107_p3 }
   0xa   : > { %p523_p7 = scmp.ge.s32.totalorder %s720_s15, 1  ;;  %p149_p8 = scmp.lt.s32.totalorder %s720_s15, 3 }
   0xc   : > { %p150_p9 = pnand %p523_p7, %p149_p8 }
   0xd   : > { %s800_s28 = sshll.u32 (!%p150_p9), %s766_s16, 4  ;;  %s174_s19 = sand.u32 (!%p150_p9), 1, %s712_s13  }
   0xe   : > { %153 = sbr.rel (%p150_p9) target bundleno = 268 (0x10c), region = 32  ;;  %p182_p10 = scmp.lt.s32.totalorder (!%p150_p9), %s800_s28, 24 }
   0xf   : > { %s524_s20 = sshll.u32 (!%p150_p9), %s174_s19, 7  ;;  %s876_s27 = scalar_lea.sflag (!%p150_p9), [#allocation3], %s174_s19 }
  0x10   : > { %s856_s26 = scalar_lea.vmem (!%p150_p9), [#allocation2], %s524_s20 }
  0x13   : > { %v216_v0 = vld [vmem:[%s937_s1 + $0x20] sm:$0x1]  ;;  %vm273_vm0 = vcmask 1040384   ;;  %v215_v1 = vld [vmem:[%s937_s1 + $0x18] sm:$0xff]  ;;  %v214_v2 = vld [vmem:[%s937_s1 + $0x10] sm:$0xff]  ;;  %s183_s4 = scalar_select %p182_p10, %s800_s28, 24 }
  0x14   : > { %576 = vmatprep.subr.msk.mxu0 %vm273_vm0, %v216_v0  ;;  %610 = vmatprep.subr.msk.mxu1 %vm273_vm0, %v216_v0  ;;  %v213_v3 = vld [vmem:[%s937_s1 + $0x8] sm:$0xff]  ;;  %v212_v4 = vld [vmem:[%s937_s1] sm:$0xff]  ;;  %vm224_vm1 = vcmask 269312   ;;  %s447_s29 = ssub.s32 (%p783_p5), 25, %s800_s28 }
  0x15   : > { %577 = vmatpush3.msk.msra.mxu0 %vm273_vm0, %v216_v0  ;;  %615 = vmatpush3.msk.msra.mxu1 %vm273_vm0, %v216_v0  ;;  %s526_s7 = sshll.u32 %s183_s4, 3  ;;  %v527_v21 = vld [vmem:[%s938_s2] ss:$0 sm:$0xff]  ;;  %p448_p11 = scmp.lt.s32.totalorder (%p783_p5), %s447_s29, 16 }
  0x16   : > { %578 = vmatprep.subr.mxu0 %v215_v1  ;;  %611 = vmatprep.subr.mxu1 %v215_v1  ;;  %s816_s17 = scalar_lea.vmem %s936_s0, %s526_s7 }
  0x17   : > { %579 = vmatpush3.msra.mxu0 %v215_v1  ;;  %616 = vmatpush3.msra.mxu1 %v215_v1  ;;  %v196_v5 = vld [vmem:[%s816_s17] sm:$0xff]  ;;  %v197_v7 = vld [vmem:[%s816_s17 + $0x8] sm:$0xff]  ;;  %v198_v9 = vld [vmem:[%s816_s17 + $0x10] sm:$0xff] }
  0x18   : > { %580 = vmatprep.subr.mxu0 %v214_v2  ;;  %612 = vmatprep.subr.mxu1 %v214_v2  ;;  %v204_v6 = vld [vmem:[%s816_s17 + $0x40] sm:$0xff]  ;;  %v205_v8 = vld [vmem:[%s816_s17 + $0x48] sm:$0xff]  ;;  %v206_v10 = vld [vmem:[%s816_s17 + $0x50] sm:$0xff] }
  0x19   : > { %581 = vmatpush3.msra.mxu0 %v214_v2  ;;  %617 = vmatpush3.msra.mxu1 %v214_v2  ;;  %v199_v11 = vld [vmem:[%s816_s17 + $0x18] sm:$0xff]  ;;  %v200_v13 = vld [vmem:[%s816_s17 + $0x20] sm:$0xff]  ;;  %v201_v15 = vld [vmem:[%s816_s17 + $0x28] sm:$0xff] }
  0x1a   : > { %582 = vmatprep.subr.mxu0 %v213_v3  ;;  %613 = vmatprep.subr.mxu1 %v213_v3  ;;  %v207_v12 = vld [vmem:[%s816_s17 + $0x58] sm:$0xff]  ;;  %v208_v14 = vld [vmem:[%s816_s17 + $0x60] sm:$0xff]  ;;  %v209_v16 = vld [vmem:[%s816_s17 + $0x68] sm:$0xff] }
  0x1b   : > { %583 = vmatpush3.msra.mxu0 %v213_v3  ;;  %618 = vmatpush3.msra.mxu1 %v213_v3  ;;  %v202_v17 = vld [vmem:[%s816_s17 + $0x30] sm:$0xff]  ;;  %v203_v19 = vld [vmem:[%s816_s17 + $0x38] sm:$0xff] }
  0x1c   : > { %584 = vmatprep.subr.mxu0 %v212_v4  ;;  %614 = vmatprep.subr.mxu1 %v212_v4  ;;  %v210_v18 = vld [vmem:[%s816_s17 + $0x70] sm:$0xff]  ;;  %v211_v20 = vld [vmem:[%s816_s17 + $0x78] sm:$0xff] }
  0x1d   : > { %585 = vmatpush3.msra.mxu0 %v212_v4  ;;  %619 = vmatpush3.msra.mxu1 %v212_v4 }
  0x1e   : > { %586 = vmatprep.mubr.msk.f32.mxu0 %vm224_vm1, %v196_v5  ;;  %598 = vmatprep.mubr.msk.f32.mxu1 %vm224_vm1, %v204_v6 }
  0x1f   : > { %587 = vmatmul.mubr.msk.f32.vlgmr.msra.gmra.mxu0 %vm224_vm1, %v197_v7  ;;  %599 = vmatmul.mubr.msk.f32.vlgmr.msra.gmra.mxu1 %vm224_vm1, %v205_v8 }
  0x20   : > { %589 = vmatprep.mubr.msk.f32.mxu0 %vm224_vm1, %v198_v9  ;;  %601 = vmatprep.mubr.msk.f32.mxu1 %vm224_vm1, %v206_v10 }
  0x23   : > { %590 = vmatmul.mubr.msk.f32.gmra.mxu0 %vm224_vm1, %v199_v11  ;;  %602 = vmatmul.mubr.msk.f32.gmra.mxu1 %vm224_vm1, %v207_v12 }
  0x24   : > { %592 = vmatprep.mubr.msk.f32.mxu0 %vm224_vm1, %v200_v13  ;;  %604 = vmatprep.mubr.msk.f32.mxu1 %vm224_vm1, %v208_v14 }
  0x27   : > { %593 = vmatmul.mubr.msk.f32.gmra.mxu0 %vm224_vm1, %v201_v15  ;;  %605 = vmatmul.mubr.msk.f32.gmra.mxu1 %vm224_vm1, %v209_v16 }
  0x28   : > { %595 = vmatprep.mubr.msk.f32.mxu0 %vm224_vm1, %v202_v17  ;;  %607 = vmatprep.mubr.msk.f32.mxu1 %vm224_vm1, %v210_v18 }
  0x2b   : > { %596 = vmatmul.mubr.msk.f32.gmra.mxu0 %vm224_vm1, %v203_v19  ;;  %608 = vmatmul.mubr.msk.f32.gmra.mxu1 %vm224_vm1, %v211_v20 }
  0xdf   : > { %v588_v22 = vpop.f32.mrf.mxu0  ;;  %v600_v23 = vpop.f32.mrf.mxu1 }
  0xe0   : > { %v349_v24 = vadd.f32 %v588_v22, %v527_v21  ;;  %v389_v25 = vadd.f32 %v600_v23, %v527_v21 }
  0xe1   : > { %v343_v26 = vpop.f32.mrf.mxu0  ;;  %v383_v27 = vpop.f32.mrf.mxu1 }
  0xe2   : > { %423 = vst [vmem:[%s856_s26 + $0x8] sm:$0xff] %v349_v24  ;;  %431 = vst [vmem:[%s856_s26 + $0x48] sm:$0xff] %v389_v25  ;;  %v344_v28 = vadd.f32 %v527_v21, %v343_v26  ;;  %v384_v29 = vadd.f32 %v527_v21, %v383_v27 }
  0xe3   : > { %v591_v30 = vpop.f32.mrf.mxu0  ;;  %v603_v31 = vpop.f32.mrf.mxu1 }
  0xe4   : > { %422 = vst [vmem:[%s856_s26] sm:$0xff] %v344_v28  ;;  %430 = vst [vmem:[%s856_s26 + $0x40] sm:$0xff] %v384_v29  ;;  %v359_v32 = vadd.f32 %v591_v30, %v527_v21  ;;  %v399_v33 = vadd.f32 %v603_v31, %v527_v21 }
  0xe5   : > { %v353_v34 = vpop.f32.mrf.mxu0  ;;  %v393_v35 = vpop.f32.mrf.mxu1 }
  0xe6   : > { %425 = vst [vmem:[%s856_s26 + $0x18] sm:$0xff] %v359_v32  ;;  %433 = vst [vmem:[%s856_s26 + $0x58] sm:$0xff] %v399_v33  ;;  %v354_v36 = vadd.f32 %v527_v21, %v353_v34  ;;  %v394_v37 = vadd.f32 %v527_v21, %v393_v35 }
  0xe7   : > { %v594_v38 = vpop.f32.mrf.mxu0  ;;  %v606_v39 = vpop.f32.mrf.mxu1 }
  0xe8   : > { %424 = vst [vmem:[%s856_s26 + $0x10] sm:$0xff] %v354_v36  ;;  %432 = vst [vmem:[%s856_s26 + $0x50] sm:$0xff] %v394_v37  ;;  %v369_v40 = vadd.f32 %v594_v38, %v527_v21  ;;  %v409_v41 = vadd.f32 %v606_v39, %v527_v21 }
  0xe9   : > { %v363_v42 = vpop.f32.mrf.mxu0  ;;  %v403_v43 = vpop.f32.mrf.mxu1 }
  0xea   : > { %427 = vst [vmem:[%s856_s26 + $0x28] sm:$0xff] %v369_v40  ;;  %435 = vst [vmem:[%s856_s26 + $0x68] sm:$0xff] %v409_v41  ;;  %v364_v44 = vadd.f32 %v527_v21, %v363_v42  ;;  %v404_v45 = vadd.f32 %v527_v21, %v403_v43 }
  0xeb   : > { %v597_v46 = vpop.f32.mrf.mxu0  ;;  %v609_v47 = vpop.f32.mrf.mxu1 }
  0xec   : > { %426 = vst [vmem:[%s856_s26 + $0x20] sm:$0xff] %v364_v44  ;;  %434 = vst [vmem:[%s856_s26 + $0x60] sm:$0xff] %v404_v45  ;;  %v379_v48 = vadd.f32 %v597_v46, %v527_v21  ;;  %v419_v49 = vadd.f32 %v609_v47, %v527_v21  ;;  %445 = sbr.rel (!%p783_p5) target bundleno = 268 (0x10c), region = 36 }
  0xed   : > { %v373_v50 = vpop.f32.mrf.mxu0  ;;  %v413_v51 = vpop.f32.mrf.mxu1 }
  0xee   : > { %429 = vst [vmem:[%s856_s26 + $0x38] sm:$0xff] %v379_v48  ;;  %437 = vst [vmem:[%s856_s26 + $0x78] sm:$0xff] %v419_v49  ;;  %v374_v52 = vadd.f32 %v527_v21, %v373_v50  ;;  %v414_v53 = vadd.f32 %v527_v21, %v413_v51 }
  0xf0   : > { %428 = vst [vmem:[%s856_s26 + $0x30] sm:$0xff] %v374_v52  ;;  %436 = vst [vmem:[%s856_s26 + $0x70] sm:$0xff] %v414_v53 }
  0xf1   : > { %s947_s29 = smov (!%p448_p11, %s447_s29), 16 }
  0xf2   : > { %s881_s30 = sshll.u32 %s947_s29, 7 }
  0xf3   : > { %s452_s4 = ssub.s32 2048, %s881_s30 }
  0xf4   : > { %453 = vsyncadd %s876_s27, %s452_s4  ;;  %p548_p12 = scmp.ne.s32.totalorder %s881_s30, 0  ;;  %s554_s5 = sshll.u32 %s766_s16, 11 }
  0xf5   : > { %s890_s7 = scalar_lea.hbm %s939_s3, %s554_s5  ;;  %s458_s28 = sshll.u32 %s856_s26, 4  ;;  %s893_s28 = int_to_ptr.vmem [resolvable:$true] %s458_s28 }
  0xf6   : > { %s660_s8 = scalar_lea.vmem %s893_s28, %s881_s30  ;;  %s722_s9 = smov [#allocation2]  }
  0xf7   : > { %p661_p13 = scmp.ne.s32.totalorder %s893_s28, %s660_s8  ;;  %s664_s10 = sshll.u32 %s722_s9, 4  ;;  %s665_s10 = int_to_ptr.vmem [resolvable:$false] %s664_s10 }
  0xf8   : > { %s666_s16 = scalar_lea.vmem %s665_s10, 4096  ;;  %p667_p2 = scmp.lt.s32.totalorder %s893_s28, %s665_s10 }
  0xf9   : > { %p662_p0 = pnand %p661_p13, %p548_p12  ;;  %p668_p3 = scmp.lt.s32.totalorder %s666_s16, %s660_s8 }
  0xfb   : > { %p663_p1 = pneg %p662_p0  ;;  %p669_p4 = por %p668_p3, %p667_p2 }
  0xfd   : > { %p670_p5 = pnand %p669_p4, %p663_p1 }
  0xff   : > { %673 = shalt.err (!%p670_p5)
}
 0x100   : > { %s674_s11 = scalar_lea.hbm %s890_s7, %s881_s30  ;;  %s678_s20 = scalar_lea.hbm %s939_s3, 3200 }
 0x101   : > { %p675_p7 = scmp.ne.s32.totalorder %s890_s7, %s674_s11  ;;  %p679_p10 = scmp.lt.s32.totalorder %s890_s7, %s939_s3 }
 0x102   : > { %p680_p11 = scmp.lt.s32.totalorder %s678_s20, %s674_s11 }
 0x103   : > { %p676_p8 = pnand %p675_p7, %p548_p12 }
 0x104   : > { %p681_p13 = por %p680_p11, %p679_p10 }
 0x105   : > { %p677_p9 = pneg %p676_p8 }
 0x107   : > { %p682_p0 = pnand %p681_p13, %p677_p9 }
 0x109   : > { %685 = shalt.err (!%p682_p0)
}
 0x10a   : > { %s723_s26 = smov 128   ;;  %s724_s29 = smov 8  }
 0x10b   : > { %464 = dma.vmem_to_hbm [thread:$0]  (%p548_p12), %s893_s28, %s881_s30, %s890_s7, %s876_s27, %s723_s26, %s723_s26, %s724_s29  }
 0x10c PF: > { %p625_p1 = scmp.ge.s32.totalorder %s720_s15, 2  ;;  %s473_s4 = sand.u32 1, %s708_s12  }
 0x10d   : > { %s474_s5 = scalar_lea.sflag [#allocation3], %s473_s4 }
 0x10e   : > { %p622_p2 = pnand %p625_p1, %p787_p6 }
 0x110   : > { %p623_p3 = pneg %p622_p2 }
 0x112   : > { %703 = dma.done.wait (%p623_p3), %s474_s5, 2048  }
 0x113   : > { %705 = vsyncadd (%p623_p3), %s474_s5, 4294965248  ;;  %p13_p4 = scmp.ge.s32.totalorder %s770_s18, 4   ;;  %s942_s12 = smov %s712_s13 }
 0x114   : > { %s943_s13 = smov %s716_s14  ;;  %s944_s14 = smov %s781_s21 }
 0x115   : > { %s945_s15 = smov %s770_s18  ;;  %15 = sbr.rel (!%p13_p4) target bundleno = 3 (0x3), region = 67 }
 0x11a   :  { %479 = vsyncpa [#allocation3], 1 }
 0x11b   :  { %481 = vsyncpa [#allocation3 + $0x1], 1 }

</bundles_post_ra>
